<compile_context>
chip_gen: v7x
topology: tpu7x:2x2x1
jax: 0.10.0
libtpu: 0.0.40
codegen_flags: <defaults>
</compile_context>

<pallas_src>
import functools
import math

import jax
import jax.numpy as jnp
from jax.experimental import pallas as pl
from jax.experimental.pallas import tpu as pltpu

_MASK_VALUE = -1e30                      # finite: avoids NaN on fully-masked rows
_VMEM_LIMIT_BYTES = 48 * 1024 * 1024     # safe on v7x (64 MiB); raise on v5e/v6e


# ---------------------------------------------------------------------------
# Row-tiled linear projection:  y = x @ W + b
# W is passed input-major (Din, Dout) -> no in-kernel transpose; weights/bias
# are held resident across grid steps (constant index_map), x/out row-tiled.
# (On v7x, pipeline_mode=pl.Buffered(1) on the resident weight spec would drop
#  its second buffer and buy tile headroom.)
# ---------------------------------------------------------------------------
def _linear_kernel(x_ref, w_ref, b_ref, o_ref):
    # x_ref: (TR, Din)  w_ref: (Din, Dout)  b_ref: (1, Dout)  o_ref: (TR, Dout)
    y = jnp.dot(x_ref[...], w_ref[...], preferred_element_type=jnp.float32)
    o_ref[...] = (y + b_ref[...].astype(jnp.float32)).astype(o_ref.dtype)


def _linear(x2d, w_im, b, *, row_tile, vmem_limit_bytes):
    rows, d_in = x2d.shape
    d_out = w_im.shape[1]
    assert w_im.shape[0] == d_in
    assert rows % row_tile == 0, f"rows={rows} not divisible by row_tile={row_tile}"
    return pl.pallas_call(
        _linear_kernel,
        out_shape=jax.ShapeDtypeStruct((rows, d_out), x2d.dtype),
        grid_spec=pltpu.PrefetchScalarGridSpec(
            num_scalar_prefetch=0,
            grid=(rows // row_tile,),
            in_specs=[
                pl.BlockSpec((row_tile, d_in), lambda r: (r, 0)),
                pl.BlockSpec((d_in, d_out), lambda r: (0, 0)),   # resident weights
                pl.BlockSpec((1, d_out), lambda r: (0, 0)),      # resident bias
            ],
            out_specs=pl.BlockSpec((row_tile, d_out), lambda r: (r, 0)),
        ),
        compiler_params=pltpu.CompilerParams(
            dimension_semantics=("parallel",),
            vmem_limit_bytes=vmem_limit_bytes),
    )(x2d, w_im, b.reshape(1, d_out))


# ---------------------------------------------------------------------------
# Flash-style attention body, shared by all three call wrappers.
# grid = (batch, head, q_tile, k_tile); last axis is the online-softmax
# reduction ("arbitrary"), output block resident across it.
# ---------------------------------------------------------------------------
def _flash_body(q_ref, k_ref, v_ref, o_ref, m_sc, l_sc, acc_sc, w_ref, b_ref, *,
                scale, causal, q_tile, k_tile):
    qi = pl.program_id(2)
    ki = pl.program_id(3)

    @pl.when(ki == 0)
    def _init():
        m_sc[...] = jnp.full(m_sc.shape, _MASK_VALUE, dtype=m_sc.dtype)
        l_sc[...] = jnp.zeros(l_sc.shape, dtype=l_sc.dtype)
        acc_sc[...] = jnp.zeros(acc_sc.shape, dtype=acc_sc.dtype)

    def _step(apply_mask):
        q = q_ref[0]                          # (TQ, dh), kept in input dtype
        k = k_ref[0]                          # (TK, dh)
        v = v_ref[0]                          # (TK, dh)
        # Raw (unscaled) scores; q @ k^T without any in-kernel transpose.
        # The 1/sqrt(dh) scale is folded into the exponent below, so q is never
        # rescaled per key step and no precision is lost to input-dtype scaling.
        s = jax.lax.dot_general(q, k, (((1,), (1,)), ((), ())),
                                preferred_element_type=jnp.float32)   # (TQ, TK)
        if apply_mask:
            row = qi * q_tile + jax.lax.broadcasted_iota(jnp.int32, (q_tile, k_tile), 0)
            col = ki * k_tile + jax.lax.broadcasted_iota(jnp.int32, (q_tile, k_tile), 1)
            s = jnp.where(col > row, _MASK_VALUE, s)

        m_prev = m_sc[...]                                            # (TQ, 1)
        m_new = jnp.maximum(m_prev, jnp.max(s, axis=-1, keepdims=True))
        alpha = jnp.exp(scale * (m_prev - m_new))                     # (TQ, 1)
        p = jnp.exp(scale * (s - m_new))                              # (TQ, TK)
        l_sc[...] = alpha * l_sc[...] + jnp.sum(p, axis=-1, keepdims=True)
        acc_sc[...] = alpha * acc_sc[...] + jnp.dot(
            p.astype(v.dtype), v, preferred_element_type=jnp.float32)
        m_sc[...] = m_new

    if causal:
        # ki ascends from 0, and the ki==0 tile always contains unmasked
        # diagonal entries, so m never stays at _MASK_VALUE for a live row.
        q_first = qi * q_tile
        q_last = q_first + (q_tile - 1)
        k_first = ki * k_tile
        k_last = k_first + (k_tile - 1)
        needed = k_first <= q_last        # tile has at least one unmasked entry
        diag = k_last > q_first           # tile straddles the diagonal -> mask it

        @pl.when(jnp.logical_and(needed, diag))
        def _masked():
            _step(apply_mask=True)

        @pl.when(jnp.logical_and(needed, jnp.logical_not(diag)))
        def _unmasked():
            _step(apply_mask=False)
    else:
        _step(apply_mask=False)

    @pl.when(ki == pl.num_programs(3) - 1)
    def _finalize():
        # Exact normalization (approx reciprocal cost too much accuracy; the
        # exact divide is one (TQ, 1) op per q tile).
        attn = acc_sc[...] / l_sc[...]                                # (TQ, dh) f32
        if w_ref is None:
            o_ref[0] = attn.astype(o_ref.dtype)
        else:
            # Fused out_proj epilogue (n_heads == 1): y = attn @ W_out^T + b.
            y = jnp.dot(attn.astype(w_ref.dtype), w_ref[...],
                        preferred_element_type=jnp.float32)
            o_ref[0] = (y + b_ref[...].astype(jnp.float32)).astype(o_ref.dtype)


def _flash_kernel(q_ref, k_ref, v_ref, o_ref, m_sc, l_sc, acc_sc, *,
                  scale, causal, q_tile, k_tile):
    _flash_body(q_ref, k_ref, v_ref, o_ref, m_sc, l_sc, acc_sc, None, None,
                scale=scale, causal=causal, q_tile=q_tile, k_tile=k_tile)


def _flash_outproj_kernel(q_ref, k_ref, v_ref, w_ref, b_ref, o_ref,
                          m_sc, l_sc, acc_sc, *, scale, causal, q_tile, k_tile):
    _flash_body(q_ref, k_ref, v_ref, o_ref, m_sc, l_sc, acc_sc, w_ref, b_ref,
                scale=scale, causal=causal, q_tile=q_tile, k_tile=k_tile)


def _flash_scratch(q_tile, dh):
    return [
        pltpu.VMEM((q_tile, 1), jnp.float32),     # running max  m
        pltpu.VMEM((q_tile, 1), jnp.float32),     # running sum  l
        pltpu.VMEM((q_tile, dh), jnp.float32),    # output accumulator
    ]


_FLASH_SEMANTICS = ("parallel", "parallel", "parallel", "arbitrary")


# ---------------------------------------------------------------------------
# Flash call wrappers (lane-dense direct, n_heads==1 fused, lane-sparse split)
# ---------------------------------------------------------------------------
def _flash_direct(qkv, *, n_heads, scale, causal, q_tile, k_tile, vmem_limit_bytes):
    """Heads sliced straight out of (B, S, 3D) by BlockSpec column indices."""
    B, S, three_d = qkv.shape
    H = n_heads
    D = three_d // 3
    dh = D // H
    kernel = functools.partial(_flash_kernel, scale=scale, causal=causal,
                               q_tile=q_tile, k_tile=k_tile)
    return pl.pallas_call(
        kernel,
        out_shape=jax.ShapeDtypeStruct((B, S, D), qkv.dtype),
        grid_spec=pltpu.PrefetchScalarGridSpec(
            num_scalar_prefetch=0,
            grid=(B, H, S // q_tile, S // k_tile),
            in_specs=[
                pl.BlockSpec((1, q_tile, dh), lambda b, h, qi, ki: (b, qi, h)),
                pl.BlockSpec((1, k_tile, dh), lambda b, h, qi, ki: (b, ki, H + h)),
                pl.BlockSpec((1, k_tile, dh), lambda b, h, qi, ki: (b, ki, 2 * H + h)),
            ],
            out_specs=pl.BlockSpec((1, q_tile, dh), lambda b, h, qi, ki: (b, qi, h)),
            scratch_shapes=_flash_scratch(q_tile, dh)),
        compiler_params=pltpu.CompilerParams(
            dimension_semantics=_FLASH_SEMANTICS,
            vmem_limit_bytes=vmem_limit_bytes),
    )(qkv, qkv, qkv)


def _flash_fused(qkv, w_out_im, b_out, *, scale, causal, q_tile, k_tile,
                 vmem_limit_bytes):
    """n_heads == 1: attention with out_proj fused into the epilogue."""
    B, S, three_d = qkv.shape
    D = three_d // 3
    kernel = functools.partial(_flash_outproj_kernel, scale=scale, causal=causal,
                               q_tile=q_tile, k_tile=k_tile)
    return pl.pallas_call(
        kernel,
        out_shape=jax.ShapeDtypeStruct((B, S, D), qkv.dtype),
        grid_spec=pltpu.PrefetchScalarGridSpec(
            num_scalar_prefetch=0,
            grid=(B, 1, S // q_tile, S // k_tile),
            in_specs=[
                pl.BlockSpec((1, q_tile, D), lambda b, h, qi, ki: (b, qi, 0)),
                pl.BlockSpec((1, k_tile, D), lambda b, h, qi, ki: (b, ki, 1)),
                pl.BlockSpec((1, k_tile, D), lambda b, h, qi, ki: (b, ki, 2)),
                pl.BlockSpec((D, D), lambda b, h, qi, ki: (0, 0)),    # resident W_out
                pl.BlockSpec((1, D), lambda b, h, qi, ki: (0, 0)),    # resident bias
            ],
            out_specs=pl.BlockSpec((1, q_tile, D), lambda b, h, qi, ki: (b, qi, 0)),
            scratch_shapes=_flash_scratch(q_tile, D)),
        compiler_params=pltpu.CompilerParams(
            dimension_semantics=_FLASH_SEMANTICS,
            vmem_limit_bytes=vmem_limit_bytes),
    )(qkv, qkv, qkv, w_out_im, b_out.reshape(1, D))


def _flash_split(q, k, v, *, n_heads, scale, causal, q_tile, k_tile,
                 vmem_limit_bytes):
    """Fallback for lane-sparse head_dim: q/k/v already split to (B*H, S, dh)."""
    BH, S, dh = q.shape
    H = n_heads
    B = BH // H
    kernel = functools.partial(_flash_kernel, scale=scale, causal=causal,
                               q_tile=q_tile, k_tile=k_tile)
    return pl.pallas_call(
        kernel,
        out_shape=jax.ShapeDtypeStruct((BH, S, dh), q.dtype),
        grid_spec=pltpu.PrefetchScalarGridSpec(
            num_scalar_prefetch=0,
            grid=(B, H, S // q_tile, S // k_tile),
            in_specs=[
                pl.BlockSpec((1, q_tile, dh), lambda b, h, qi, ki: (b * H + h, qi, 0)),
                pl.BlockSpec((1, k_tile, dh), lambda b, h, qi, ki: (b * H + h, ki, 0)),
                pl.BlockSpec((1, k_tile, dh), lambda b, h, qi, ki: (b * H + h, ki, 0)),
            ],
            out_specs=pl.BlockSpec((1, q_tile, dh),
                                   lambda b, h, qi, ki: (b * H + h, qi, 0)),
            scratch_shapes=_flash_scratch(q_tile, dh)),
        compiler_params=pltpu.CompilerParams(
            dimension_semantics=_FLASH_SEMANTICS,
            vmem_limit_bytes=vmem_limit_bytes),
    )(q, k, v)


# ---------------------------------------------------------------------------
# Parameter preparation (once, at load time, outside the jitted forward)
# ---------------------------------------------------------------------------
def prepare_self_attention_params(w_in, b_in, w_out, b_out):
    """Convert PyTorch nn.Linear layout (out_features, in_features) to the
    input-major layout consumed by the kernels.  Do this once at parameter
    load time so the forward never pays a per-call HBM transpose."""
    return jnp.asarray(w_in).T, jnp.asarray(b_in), jnp.asarray(w_out).T, jnp.asarray(b_out)


def _pick_seq_tile(s_len):
    # Keep tiles >= 256 where the sequence allows it (v6e/v7x 256-wide MXU);
    # small sequences use the full extent.
    if s_len <= 512:
        return s_len
    for t in (512, 256, 128, 64, 32, 16, 8):
        if s_len % t == 0:
            return t
    return s_len


def _pick_row_tile(rows):
    if rows <= 512:
        return rows
    for t in (512, 256, 128, 64, 32, 16, 8):
        if rows % t == 0:
            return t
    return rows


# ---------------------------------------------------------------------------
# Full SelfAttention forward
# ---------------------------------------------------------------------------
def self_attention_pallas(x, w_in_im, b_in, w_out_im, b_out, *, n_heads,
                          causal=False, q_tile=None, k_tile=None, row_tile=None,
                          vmem_limit_bytes=_VMEM_LIMIT_BYTES):
    """x: (B, S, D).  w_in_im: (D, 3D) input-major, w_out_im: (D, D) input-major
    (see prepare_self_attention_params)."""
    B, S, D = x.shape
    assert D % n_heads == 0, "d_embed must be divisible by n_heads"
    dh = D // n_heads
    assert w_in_im.shape == (D, 3 * D) and w_out_im.shape == (D, D)
    rows = B * S

    q_tile = _pick_seq_tile(S) if q_tile is None else q_tile
    k_tile = q_tile if k_tile is None else k_tile
    assert S % q_tile == 0 and S % k_tile == 0, "S must divide the seq tiles"
    assert (q_tile == S or q_tile % 8 == 0) and (k_tile == S or k_tile % 8 == 0)
    row_tile = _pick_row_tile(rows) if row_tile is None else row_tile
    assert rows % row_tile == 0 and (row_tile == rows or row_tile % 8 == 0)

    scale = 1.0 / math.sqrt(dh)

    # in_proj: (B*S, D) @ (D, 3D) + b -> (B, S, 3D), consumed in place below.
    qkv = _linear(x.reshape(rows, D), w_in_im, b_in,
                  row_tile=row_tile,
                  vmem_limit_bytes=vmem_limit_bytes).reshape(B, S, 3 * D)

    lane_dense = dh % 128 == 0

    if lane_dense and n_heads == 1:
        # Trivial head layout: fuse out_proj into the attention epilogue and
        # skip the second projection pass over HBM entirely.
        return _flash_fused(qkv, w_out_im, b_out, scale=scale, causal=causal,
                            q_tile=q_tile, k_tile=k_tile,
                            vmem_limit_bytes=vmem_limit_bytes)

    if lane_dense:
        # Heads sliced straight out of qkv by BlockSpec index maps; no q/k/v
        # materialization or head transposes in HBM.
        o = _flash_direct(qkv, n_heads=n_heads, scale=scale, causal=causal,
                          q_tile=q_tile, k_tile=k_tile,
                          vmem_limit_bytes=vmem_limit_bytes)          # (B, S, D)
        o2 = o.reshape(rows, D)
    else:
        # TODO(synk): lane-sparse head_dim (not a multiple of 128) cannot be
        # column-sliced out of qkv under Mosaic's (8,128) block rule; fall back
        # to an XLA head split/merge (extra HBM traffic) for that corner.
        qkv5 = qkv.reshape(B, S, 3, n_heads, dh)

        def _heads(i):
            return qkv5[:, :, i].transpose(0, 2, 1, 3).reshape(B * n_heads, S, dh)

        o = _flash_split(_heads(0), _heads(1), _heads(2), n_heads=n_heads,
                         scale=scale, causal=causal, q_tile=q_tile, k_tile=k_tile,
                         vmem_limit_bytes=vmem_limit_bytes)           # (B*H, S, dh)
        o2 = o.reshape(B, n_heads, S, dh).transpose(0, 2, 1, 3).reshape(rows, D)

    # out_proj
    y = _linear(o2, w_out_im, b_out, row_tile=row_tile,
                vmem_limit_bytes=vmem_limit_bytes)
    return y.reshape(B, S, D)


# ---------------------------------------------------------------------------
# Pure-JAX reference mirroring the PyTorch forward (PyTorch weight layout).
# ---------------------------------------------------------------------------
def self_attention_ref(x, w_in, b_in, w_out, b_out, *, n_heads, causal=False):
    B, S, D = x.shape
    dh = D // n_heads
    hi = jax.lax.Precision.HIGHEST
    qkv = jnp.einsum("bsd,ed->bse", x, w_in, precision=hi) + b_in     # (B, S, 3D)
    q, k, v = jnp.split(qkv, 3, axis=-1)

    def split_heads(t):
        return t.reshape(B, S, n_heads, dh).transpose(0, 2, 1, 3)

    q, k, v = map(split_heads, (q, k, v))
    s = jnp.einsum("bhqd,bhkd->bhqk", q, k, precision=hi) / math.sqrt(dh)
    if causal:
        mask = jnp.triu(jnp.ones((S, S), dtype=bool), k=1)
        s = jnp.where(mask, -jnp.inf, s)
    p = jax.nn.softmax(s, axis=-1)
    o = jnp.einsum("bhqk,bhkd->bhqd", p, v, precision=hi)
    o = o.transpose(0, 2, 1, 3).reshape(B, S, D)
    return jnp.einsum("bsd,ed->bse", o, w_out, precision=hi) + b_out


if __name__ == "__main__":
    def _make_params(key, d_embed):
        kwi, kbi, kwo, kbo = jax.random.split(key, 4)
        # PyTorch nn.Linear weight layout: (out_features, in_features)
        w_in = jax.random.normal(kwi, (3 * d_embed, d_embed), jnp.float32) / math.sqrt(d_embed)
        b_in = jax.random.normal(kbi, (3 * d_embed,), jnp.float32) * 0.01
        w_out = jax.random.normal(kwo, (d_embed, d_embed), jnp.float32) / math.sqrt(d_embed)
        b_out = jax.random.normal(kbo, (d_embed,), jnp.float32) * 0.01
        return w_in, b_in, w_out, b_out

    def _check(name, *, B, S, D, n_heads, causal, q_tile, k_tile, key):
        kx, kp = jax.random.split(key)
        x = jax.random.normal(kx, (B, S, D), jnp.float32)
        w_in, b_in, w_out, b_out = _make_params(kp, D)
        w_in_im, b_in_p, w_out_im, b_out_p = prepare_self_attention_params(
            w_in, b_in, w_out, b_out)
        out = self_attention_pallas(x, w_in_im, b_in_p, w_out_im, b_out_p,
                                    n_heads=n_heads, causal=causal,
                                    q_tile=q_tile, k_tile=k_tile)
        out = jax.block_until_ready(out)
        assert out.shape == (B, S, D)
        ref = self_attention_ref(x, w_in, b_in, w_out, b_out,
                                 n_heads=n_heads, causal=causal)
        err = float(jnp.max(jnp.abs(out - ref)))
        assert jnp.allclose(out, ref, atol=1e-3, rtol=1e-3), \
            f"mismatch ({name}): max|diff|={err}"

    key = jax.random.PRNGKey(0)
    k1, k2, k3, k4 = jax.random.split(key, 4)

    # Multi-head, lane-dense direct path (heads sliced out of qkv by BlockSpec);
    # q_tile=k_tile=8 exercises the multi-key-tile online softmax at S=16.
    _check("direct non-causal", B=2, S=16, D=256, n_heads=2, causal=False,
           q_tile=8, k_tile=8, key=k1)
    # Causal: exercises tile skipping + diagonal-straddling mask path.
    _check("direct causal", B=2, S=16, D=256, n_heads=2, causal=True,
           q_tile=8, k_tile=8, key=k2)
    # n_heads == 1: out_proj fused into the attention epilogue.
    _check("fused out_proj", B=2, S=16, D=128, n_heads=1, causal=True,
           q_tile=8, k_tile=8, key=k3)
    # Lane-sparse head_dim (dh=8 < 128): XLA head split/merge fallback path.
    _check("split fallback", B=2, S=16, D=32, n_heads=4, causal=False,
           q_tile=8, k_tile=8, key=k4)

    print("KERNEL_OK")
</pallas_src>

<mosaic_0001>
module attributes {stable_mosaic.version = 11 : i64} {
  func.func @_linear_kernel(%arg0: i32, %arg1: memref<32x256xf32, #tpu.memory_space<vmem>>, %arg2: memref<256x768xf32, #tpu.memory_space<vmem>>, %arg3: memref<1x768xf32, #tpu.memory_space<vmem>>, %arg4: memref<32x768xf32, #tpu.memory_space<vmem>>) attributes {dimension_semantics = [#tpu.dimension_semantics<parallel>], iteration_bounds = array<i64: 1>, scalar_prefetch = 0 : i64, scratch_operands = 0 : i64, tpu.core_type = #tpu.core_type<tc>, window_params = [{transform_indices = @transform_0, window_bounds = array<i64: 32, 256>}, {pipeline_mode = #tpu.pipeline_mode<synchronous>, transform_indices = @transform_1, window_bounds = array<i64: 256, 768>}, {pipeline_mode = #tpu.pipeline_mode<synchronous>, transform_indices = @transform_2, window_bounds = array<i64: 1, 768>}, {transform_indices = @transform_3, window_bounds = array<i64: 32, 768>}]} {
    %c0 = arith.constant 0 : index
    %c0_0 = arith.constant 0 : index
    %0 = vector.load %arg1[%c0, %c0_0] : memref<32x256xf32, #tpu.memory_space<vmem>>, vector<32x256xf32>
    %c0_1 = arith.constant 0 : index
    %c0_2 = arith.constant 0 : index
    %1 = vector.load %arg2[%c0_1, %c0_2] : memref<256x768xf32, #tpu.memory_space<vmem>>, vector<256x768xf32>
    %cst = arith.constant dense<0.000000e+00> : vector<32x768xf32>
    %2 = tpu.matmul %0, %1, %cst {dimension_numbers = #tpu.dot_dimension_numbers<[1], [0], [0], [1], [0, 0, 1, 1], [], []>} : vector<32x256xf32>, vector<256x768xf32>, vector<32x768xf32> -> vector<32x768xf32>
    %c0_3 = arith.constant 0 : index
    %c0_4 = arith.constant 0 : index
    %3 = vector.load %arg3[%c0_3, %c0_4] : memref<1x768xf32, #tpu.memory_space<vmem>>, vector<1x768xf32>
    %4 = vector.broadcast %3 : vector<1x768xf32> to vector<32x768xf32>
    %5 = arith.addf %2, %4 : vector<32x768xf32>
    %c0_5 = arith.constant 0 : index
    %c0_6 = arith.constant 0 : index
    %6 = vector.load %arg4[%c0_5, %c0_6] : memref<32x768xf32, #tpu.memory_space<vmem>>, vector<32x768xf32>
    tpu.vector_store %arg4[%c0_5, %c0_6], %5 {strides = array<i32>} : memref<32x768xf32, #tpu.memory_space<vmem>>, vector<32x768xf32>,
    return
  }
  func.func @transform_0(%arg0: i32) -> (i32, i32) {
    %c0_i32 = arith.constant 0 : i32
    %c0_i32_0 = arith.constant 0 : i32
    return %arg0, %c0_i32 : i32, i32
  }
  func.func @transform_1(%arg0: i32) -> (i32, i32) {
    %c0_i32 = arith.constant 0 : i32
    %c0_i32_0 = arith.constant 0 : i32
    %c0_i32_1 = arith.constant 0 : i32
    return %c0_i32, %c0_i32_0 : i32, i32
  }
  func.func @transform_2(%arg0: i32) -> (i32, i32) {
    %c0_i32 = arith.constant 0 : i32
    %c0_i32_0 = arith.constant 0 : i32
    %c0_i32_1 = arith.constant 0 : i32
    return %c0_i32, %c0_i32_0 : i32, i32
  }
  func.func @transform_3(%arg0: i32) -> (i32, i32) {
    %c0_i32 = arith.constant 0 : i32
    %c0_i32_0 = arith.constant 0 : i32
    return %arg0, %c0_i32 : i32, i32
  }
}

</mosaic_0001>

<bundles_post_ra>
// kernel: tpu_custom_call.1
= control target key start
LH: loop header
LB: loop body
LE: loop exit
PB: predicated region body
PF: predicated region fallthrough
CT: control target
= control target key end

     0   :  { %8 = vsyncpa [#allocation3], 0  ;;  %s994_s0 = inlined_call_operand.hbm [shape: f32[32,256], index: 0, kind: input, shape index: {}]   ;;  %s995_s1 = inlined_call_operand.hbm [shape: f32[256,768], index: 1, kind: input, shape index: {}]   ;;  %s996_s2 = inlined_call_operand.vmem [shape: f32[1,768], index: 2, kind: input, shape index: {}]   ;;  %s997_s3 = inlined_call_operand.hbm [shape: f32[32,768], index: 3, kind: output, shape index: {}]  }
   0x1   :  { %9 = vsyncpa [#allocation6], 0 }
   0x2   :  { %10 = vsyncpa [#allocation4], 0  ;;  %s887_s12 = smov [#allocation2]   ;;  %s815_s16 = scalar_lea.hbm %s994_s0, 1024 }
   0x3   :  { %s16_s13 = sshll.u32 %s887_s12, 4  ;;  %p816_p0 = scmp.ne.s32.totalorder %s994_s0, %s815_s16  ;;  %s17_s13 = int_to_ptr.vmem [resolvable:$true] %s16_s13 }
   0x4   :  { %p819_p1 = scmp.lt.u32.totalorder %s815_s16, %s994_s0 }
   0x6   :  { %p821_p2 = pnand %p819_p1, %p816_p0 }
   0x8   :  { %824 = shalt.err (!%p821_p2)
}
   0x9   :  { %s825_s21 = scalar_lea.vmem %s17_s13, 1024  ;;  %p830_p4 = scmp.lt.s32.totalorder %s17_s13, %s17_s13 }
   0xa   :  { %p826_p3 = scmp.ne.s32.totalorder %s17_s13, %s825_s21  ;;  %p831_p5 = scmp.lt.s32.totalorder %s825_s21, %s825_s21 }
   0xc   :  { %p832_p6 = por %p831_p5, %p830_p4 }
   0xe   :  { %p833_p7 = pnand %p832_p6, %p826_p3 }
  0x10   :  { %836 = shalt.err (!%p833_p7)
}
  0x11   :  { %s888_s22 = smov 256   ;;  %s889_s23 = smov 16  }
  0x12   :  { %22 = dma.hbm_to_vmem [thread:$0]  %s994_s0, 1024, %s17_s13, [#allocation3], %s888_s22, %s888_s22, %s889_s23  }
  0x13   :  { %s890_s26 = smov [#allocation5]   ;;  %s837_s30 = scalar_lea.hbm %s995_s1, 24576 }
  0x14   :  { %s28_s27 = sshll.u32 %s890_s26, 4  ;;  %p838_p8 = scmp.ne.s32.totalorder %s995_s1, %s837_s30  ;;  %s29_s27 = int_to_ptr.vmem [resolvable:$true] %s28_s27 }
  0x15   :  { %p841_p9 = scmp.lt.u32.totalorder %s837_s30, %s995_s1 }
  0x17   :  { %p843_p10 = pnand %p841_p9, %p838_p8 }
  0x19   :  { %846 = shalt.err (!%p843_p10)
}
  0x1a   :  { %s847_s8 = scalar_lea.vmem %s29_s27, 24576  ;;  %p852_p12 = scmp.lt.s32.totalorder %s29_s27, %s29_s27 }
  0x1b   :  { %p848_p11 = scmp.ne.s32.totalorder %s29_s27, %s847_s8  ;;  %p853_p13 = scmp.lt.s32.totalorder %s847_s8, %s847_s8 }
  0x1d   :  { %p854_p0 = por %p853_p13, %p852_p12 }
  0x1f   :  { %p855_p1 = pnand %p854_p0, %p848_p11 }
  0x21   :  { %858 = shalt.err (!%p855_p1)
}
  0x22   :  { %s891_s0 = smov 768   ;;  %s892_s9 = smov 48  }
  0x23   :  { %34 = dma.hbm_to_vmem [thread:$0]  %s995_s1, 24576, %s29_s27, [#allocation6], %s891_s0, %s891_s0, %s892_s9  }
  0x24   :  { %881 = dma.done.wait [#allocation3], 1024  }
  0x25   :  { %882 = vsyncadd [#allocation3], 4294966272 }
  0x26   :  { %883 = dma.done.wait [#allocation6], 24576  }
  0x27   :  { %884 = vsyncadd [#allocation6], 4294942720  ;;  %v52_v0 = vld [vmem:[#allocation5 + $0x8] sm:$0xff]  ;;  %v58_v1 = vld [vmem:[#allocation5 + $0x38] sm:$0xff] }
  0x28   :  { %v54_v2 = vld [vmem:[#allocation5 + $0x18] sm:$0xff]  ;;  %v584_v3 = vpack.c.bf16 %v58_v1, %v52_v0  ;;  %v60_v4 = vld [vmem:[#allocation5 + $0x48] sm:$0xff]  ;;  %v51_v5 = vld [vmem:[#allocation5] sm:$0xff] }
  0x29   :  { %v57_v6 = vld [vmem:[#allocation5 + $0x30] sm:$0xff]  ;;  %v648_v7 = vpack.c.bf16 %v60_v4, %v54_v2  ;;  %v59_v10 = vld [vmem:[#allocation5 + $0x40] sm:$0xff]  ;;  %v64_v11 = vld [vmem:[#allocation5 + $0x68] sm:$0xff] }
  0x2a   :  { %v586_v8 = vpack.c.bf16 %v57_v6, %v51_v5  ;;  %v53_v9 = vld [vmem:[#allocation5 + $0x10] sm:$0xff]  ;;  %585 = vmatprep.subr.bf16.mxu0 %v584_v3  ;;  %v70_v13 = vld [vmem:[#allocation5 + $0x98] sm:$0xff]  ;;  %v72_v15 = vld [vmem:[#allocation5 + $0xa8] sm:$0xff] }
  0x2b   :  { %v650_v12 = vpack.c.bf16 %v59_v10, %v53_v9  ;;  %v66_v14 = vld [vmem:[#allocation5 + $0x78] sm:$0xff]  ;;  %649 = vmatprep.subr.bf16.mxu1 %v648_v7  ;;  %v588_v16 = vpack.c.bf16 %v70_v13, %v64_v11  ;;  %v63_v18 = vld [vmem:[#allocation5 + $0x60] sm:$0xff]  ;;  %v69_v19 = vld [vmem:[#allocation5 + $0x90] sm:$0xff] }
  0x2c   :  { %587 = vmatpush1.bf16.msra.mxu0 %v586_v8  ;;  %v652_v17 = vpack.c.bf16 %v72_v15, %v66_v14  ;;  %v65_v20 = vld [vmem:[#allocation5 + $0x70] sm:$0xff]  ;;  %v590_v21 = vpack.c.bf16 %v69_v19, %v63_v18  ;;  %v71_v22 = vld [vmem:[#allocation5 + $0xa0] sm:$0xff]  ;;  %v76_v23 = vld [vmem:[#allocation5 + $0xc8] sm:$0xff] }
  0x2d   :  { %651 = vmatpush1.bf16.msra.mxu1 %v650_v12  ;;  %v82_v24 = vld [vmem:[#allocation5 + $0xf8] sm:$0xff]  ;;  %589 = vmatprep.subr.bf16.mxu0 %v588_v16  ;;  %v654_v25 = vpack.c.bf16 %v71_v22, %v65_v20  ;;  %v84_v28 = vld [vmem:[#allocation5 + $0x108] sm:$0xff]  ;;  %v75_v29 = vld [vmem:[#allocation5 + $0xc0] sm:$0xff] }
  0x2e   :  { %653 = vmatprep.subr.bf16.mxu1 %v652_v17  ;;  %v592_v26 = vpack.c.bf16 %v82_v24, %v76_v23  ;;  %v78_v27 = vld [vmem:[#allocation5 + $0xd8] sm:$0xff]  ;;  %v81_v31 = vld [vmem:[#allocation5 + $0xf0] sm:$0xff]  ;;  %v83_v33 = vld [vmem:[#allocation5 + $0x100] sm:$0xff] }
  0x2f   :  { %v656_v30 = vpack.c.bf16 %v84_v28, %v78_v27  ;;  %v77_v32 = vld [vmem:[#allocation5 + $0xd0] sm:$0xff]  ;;  %v594_v34 = vpack.c.bf16 %v81_v31, %v75_v29  ;;  %v88_v35 = vld [vmem:[#allocation5 + $0x128] sm:$0xff]  ;;  %v94_v36 = vld [vmem:[#allocation5 + $0x158] sm:$0xff] }
  0x30   :  { %591 = vmatpush1.bf16.msra.mxu0 %v590_v21  ;;  %v90_v37 = vld [vmem:[#allocation5 + $0x138] sm:$0xff]  ;;  %v658_v38 = vpack.c.bf16 %v83_v33, %v77_v32  ;;  %v596_v39 = vpack.c.bf16 %v94_v36, %v88_v35  ;;  %v96_v40 = vld [vmem:[#allocation5 + $0x168] sm:$0xff]  ;;  %v87_v41 = vld [vmem:[#allocation5 + $0x120] sm:$0xff] }
  0x31   :  { %655 = vmatpush1.bf16.msra.mxu1 %v654_v25  ;;  %593 = vmatprep.subr.bf16.mxu0 %v592_v26  ;;  %v93_v42 = vld [vmem:[#allocation5 + $0x150] sm:$0xff]  ;;  %v660_v43 = vpack.c.bf16 %v96_v40, %v90_v37  ;;  %v95_v45 = vld [vmem:[#allocation5 + $0x160] sm:$0xff]  ;;  %v100_v46 = vld [vmem:[#allocation5 + $0x188] sm:$0xff] }
  0x32   :  { %657 = vmatprep.subr.bf16.mxu1 %v656_v30  ;;  %v89_v44 = vld [vmem:[#allocation5 + $0x130] sm:$0xff]  ;;  %v106_v47 = vld [vmem:[#allocation5 + $0x1b8] sm:$0xff]  ;;  %v108_v49 = vld [vmem:[#allocation5 + $0x1c8] sm:$0xff]  ;;  %v598_v50 = vpack.c.bf16 %v93_v42, %v87_v41 }
  0x33   :  { %v102_v48 = vld [vmem:[#allocation5 + $0x198] sm:$0xff]  ;;  %v662_v51 = vpack.c.bf16 %v95_v45, %v89_v44  ;;  %v600_v52 = vpack.c.bf16 %v106_v47, %v100_v46  ;;  %v99_v53 = vld [vmem:[#allocation5 + $0x180] sm:$0xff]  ;;  %v105_v54 = vld [vmem:[#allocation5 + $0x1b0] sm:$0xff] }
  0x34   :  { %595 = vmatpush1.bf16.msra.mxu0 %v594_v34  ;;  %v101_v55 = vld [vmem:[#allocation5 + $0x190] sm:$0xff]  ;;  %v664_v56 = vpack.c.bf16 %v108_v49, %v102_v48  ;;  %v107_v57 = vld [vmem:[#allocation5 + $0x1c0] sm:$0xff]  ;;  %v112_v58 = vld [vmem:[#allocation5 + $0x1e8] sm:$0xff]  ;;  %v602_v62 = vpack.c.bf16 %v105_v54, %v99_v53 }
  0x35   :  { %659 = vmatpush1.bf16.msra.mxu1 %v658_v38  ;;  %597 = vmatprep.subr.bf16.mxu0 %v596_v39  ;;  %v118_v59 = vld [vmem:[#allocation5 + $0x218] sm:$0xff]  ;;  %v120_v61 = vld [vmem:[#allocation5 + $0x228] sm:$0xff]  ;;  %v666_v63 = vpack.c.bf16 %v107_v57, %v101_v55  ;;  %v111_v1 = vld [vmem:[#allocation5 + $0x1e0] sm:$0xff] }
  0x36   :  { %661 = vmatprep.subr.bf16.mxu1 %v660_v43  ;;  %v114_v60 = vld [vmem:[#allocation5 + $0x1f8] sm:$0xff]  ;;  %v604_v0 = vpack.c.bf16 %v118_v59, %v112_v58  ;;  %v117_v2 = vld [vmem:[#allocation5 + $0x210] sm:$0xff]  ;;  %v119_v5 = vld [vmem:[#allocation5 + $0x220] sm:$0xff] }
  0x37   :  { %v113_v3 = vld [vmem:[#allocation5 + $0x1f0] sm:$0xff]  ;;  %v668_v4 = vpack.c.bf16 %v120_v61, %v114_v60  ;;  %v124_v6 = vld [vmem:[#allocation5 + $0x248] sm:$0xff]  ;;  %v130_v7 = vld [vmem:[#allocation5 + $0x278] sm:$0xff]  ;;  %v606_v10 = vpack.c.bf16 %v117_v2, %v111_v1 }
  0x38   :  { %599 = vmatpush1.bf16.msra.mxu0 %v598_v50  ;;  %v126_v8 = vld [vmem:[#allocation5 + $0x258] sm:$0xff]  ;;  %v132_v9 = vld [vmem:[#allocation5 + $0x288] sm:$0xff]  ;;  %v670_v11 = vpack.c.bf16 %v119_v5, %v113_v3  ;;  %v608_v12 = vpack.c.bf16 %v130_v7, %v124_v6  ;;  %v123_v13 = vld [vmem:[#allocation5 + $0x240] sm:$0xff] }
  0x39   :  { %663 = vmatpush1.bf16.msra.mxu1 %v662_v51  ;;  %601 = vmatprep.subr.bf16.mxu0 %v600_v52  ;;  %v129_v14 = vld [vmem:[#allocation5 + $0x270] sm:$0xff]  ;;  %v672_v16 = vpack.c.bf16 %v132_v9, %v126_v8  ;;  %v131_v17 = vld [vmem:[#allocation5 + $0x280] sm:$0xff]  ;;  %v136_v18 = vld [vmem:[#allocation5 + $0x2a8] sm:$0xff] }
  0x3a   :  { %665 = vmatprep.subr.bf16.mxu1 %v664_v56  ;;  %v125_v15 = vld [vmem:[#allocation5 + $0x250] sm:$0xff]  ;;  %v142_v19 = vld [vmem:[#allocation5 + $0x2d8] sm:$0xff]  ;;  %v144_v21 = vld [vmem:[#allocation5 + $0x2e8] sm:$0xff]  ;;  %v610_v22 = vpack.c.bf16 %v129_v14, %v123_v13 }
  0x3b   :  { %v138_v20 = vld [vmem:[#allocation5 + $0x2b8] sm:$0xff]  ;;  %v674_v23 = vpack.c.bf16 %v131_v17, %v125_v15  ;;  %v612_v24 = vpack.c.bf16 %v142_v19, %v136_v18  ;;  %v135_v25 = vld [vmem:[#allocation5 + $0x2a0] sm:$0xff]  ;;  %v141_v26 = vld [vmem:[#allocation5 + $0x2d0] sm:$0xff] }
  0x3c   :  { %603 = vmatpush1.bf16.msra.mxu0 %v602_v62  ;;  %v137_v27 = vld [vmem:[#allocation5 + $0x2b0] sm:$0xff]  ;;  %v676_v28 = vpack.c.bf16 %v144_v21, %v138_v20  ;;  %v143_v29 = vld [vmem:[#allocation5 + $0x2e0] sm:$0xff]  ;;  %v148_v30 = vld [vmem:[#allocation5 + $0x308] sm:$0xff]  ;;  %v614_v34 = vpack.c.bf16 %v141_v26, %v135_v25 }
  0x3d   :  { %667 = vmatpush1.bf16.msra.mxu1 %v666_v63  ;;  %605 = vmatprep.subr.bf16.mxu0 %v604_v0  ;;  %v154_v31 = vld [vmem:[#allocation5 + $0x338] sm:$0xff]  ;;  %v156_v33 = vld [vmem:[#allocation5 + $0x348] sm:$0xff]  ;;  %v678_v35 = vpack.c.bf16 %v143_v29, %v137_v27  ;;  %v147_v37 = vld [vmem:[#allocation5 + $0x300] sm:$0xff] }
  0x3e   :  { %669 = vmatprep.subr.bf16.mxu1 %v668_v4  ;;  %v150_v32 = vld [vmem:[#allocation5 + $0x318] sm:$0xff]  ;;  %v616_v36 = vpack.c.bf16 %v154_v31, %v148_v30  ;;  %v153_v38 = vld [vmem:[#allocation5 + $0x330] sm:$0xff]  ;;  %v155_v41 = vld [vmem:[#allocation5 + $0x340] sm:$0xff] }
  0x3f   :  { %v149_v39 = vld [vmem:[#allocation5 + $0x310] sm:$0xff]  ;;  %v680_v40 = vpack.c.bf16 %v156_v33, %v150_v32  ;;  %v160_v42 = vld [vmem:[#allocation5 + $0x368] sm:$0xff]  ;;  %v166_v43 = vld [vmem:[#allocation5 + $0x398] sm:$0xff]  ;;  %v618_v46 = vpack.c.bf16 %v153_v38, %v147_v37 }
  0x40   :  { %607 = vmatpush1.bf16.msra.mxu0 %v606_v10  ;;  %v162_v44 = vld [vmem:[#allocation5 + $0x378] sm:$0xff]  ;;  %v168_v45 = vld [vmem:[#allocation5 + $0x3a8] sm:$0xff]  ;;  %v682_v47 = vpack.c.bf16 %v155_v41, %v149_v39  ;;  %v620_v48 = vpack.c.bf16 %v166_v43, %v160_v42  ;;  %v159_v49 = vld [vmem:[#allocation5 + $0x360] sm:$0xff] }
  0x41   :  { %671 = vmatpush1.bf16.msra.mxu1 %v670_v11  ;;  %609 = vmatprep.subr.bf16.mxu0 %v608_v12  ;;  %v165_v50 = vld [vmem:[#allocation5 + $0x390] sm:$0xff]  ;;  %v684_v52 = vpack.c.bf16 %v168_v45, %v162_v44  ;;  %v167_v53 = vld [vmem:[#allocation5 + $0x3a0] sm:$0xff]  ;;  %v172_v54 = vld [vmem:[#allocation5 + $0x3c8] sm:$0xff] }
  0x42   :  { %673 = vmatprep.subr.bf16.mxu1 %v672_v16  ;;  %v161_v51 = vld [vmem:[#allocation5 + $0x370] sm:$0xff]  ;;  %v178_v55 = vld [vmem:[#allocation5 + $0x3f8] sm:$0xff]  ;;  %v180_v57 = vld [vmem:[#allocation5 + $0x408] sm:$0xff]  ;;  %v622_v58 = vpack.c.bf16 %v165_v50, %v159_v49 }
  0x43   :  { %v174_v56 = vld [vmem:[#allocation5 + $0x3d8] sm:$0xff]  ;;  %v686_v59 = vpack.c.bf16 %v167_v53, %v161_v51  ;;  %v624_v60 = vpack.c.bf16 %v178_v55, %v172_v54  ;;  %v171_v61 = vld [vmem:[#allocation5 + $0x3c0] sm:$0xff]  ;;  %v177_v62 = vld [vmem:[#allocation5 + $0x3f0] sm:$0xff] }
  0x44   :  { %611 = vmatpush1.bf16.msra.mxu0 %v610_v22  ;;  %v173_v63 = vld [vmem:[#allocation5 + $0x3d0] sm:$0xff]  ;;  %v688_v0 = vpack.c.bf16 %v180_v57, %v174_v56  ;;  %v179_v1 = vld [vmem:[#allocation5 + $0x400] sm:$0xff]  ;;  %v184_v2 = vld [vmem:[#allocation5 + $0x428] sm:$0xff]  ;;  %v626_v6 = vpack.c.bf16 %v177_v62, %v171_v61 }
  0x45   :  { %675 = vmatpush1.bf16.msra.mxu1 %v674_v23  ;;  %613 = vmatprep.subr.bf16.mxu0 %v612_v24  ;;  %v190_v3 = vld [vmem:[#allocation5 + $0x458] sm:$0xff]  ;;  %v192_v5 = vld [vmem:[#allocation5 + $0x468] sm:$0xff]  ;;  %v183_v7 = vld [vmem:[#allocation5 + $0x420] sm:$0xff]  ;;  %v690_v8 = vpack.c.bf16 %v179_v1, %v173_v63 }
  0x46   :  { %677 = vmatprep.subr.bf16.mxu1 %v676_v28  ;;  %v186_v4 = vld [vmem:[#allocation5 + $0x438] sm:$0xff]  ;;  %v628_v9 = vpack.c.bf16 %v190_v3, %v184_v2  ;;  %v189_v10 = vld [vmem:[#allocation5 + $0x450] sm:$0xff]  ;;  %v191_v12 = vld [vmem:[#allocation5 + $0x460] sm:$0xff] }
  0x47   :  { %v185_v11 = vld [vmem:[#allocation5 + $0x430] sm:$0xff]  ;;  %v692_v13 = vpack.c.bf16 %v192_v5, %v186_v4  ;;  %v196_v14 = vld [vmem:[#allocation5 + $0x488] sm:$0xff]  ;;  %v202_v15 = vld [vmem:[#allocation5 + $0x4b8] sm:$0xff]  ;;  %v630_v19 = vpack.c.bf16 %v189_v10, %v183_v7 }
  0x48   :  { %615 = vmatpush1.bf16.msra.mxu0 %v614_v34  ;;  %v941_v16 = vld [vmem:[#allocation2 + $0x8] sm:$0xff]  ;;  %v198_v17 = vld [vmem:[#allocation5 + $0x498] sm:$0xff]  ;;  %v694_v20 = vpack.c.bf16 %v191_v12, %v185_v11  ;;  %v632_v21 = vpack.c.bf16 %v202_v15, %v196_v14  ;;  %v195_v22 = vld [vmem:[#allocation5 + $0x480] sm:$0xff] }
  0x49   :  { %679 = vmatpush1.bf16.msra.mxu1 %v678_v35  ;;  %617 = vmatprep.subr.bf16.mxu0 %v616_v36  ;;  %v204_v18 = vld [vmem:[#allocation5 + $0x4c8] sm:$0xff]  ;;  %v201_v23 = vld [vmem:[#allocation5 + $0x4b0] sm:$0xff]  ;;  %v203_v26 = vld [vmem:[#allocation5 + $0x4c0] sm:$0xff] }
  0x4a   :  { %681 = vmatprep.subr.bf16.mxu1 %v680_v40  ;;  %339 = vmatprep.mubr.f32.mxu0 %v941_v16  ;;  %v197_v24 = vld [vmem:[#allocation5 + $0x490] sm:$0xff]  ;;  %v696_v25 = vpack.c.bf16 %v204_v18, %v198_v17  ;;  %v208_v27 = vld [vmem:[#allocation5 + $0x4e8] sm:$0xff]  ;;  %v214_v28 = vld [vmem:[#allocation5 + $0x518] sm:$0xff]  ;;  %v634_v31 = vpack.c.bf16 %v201_v23, %v195_v22 }
  0x4b   :  { %428 = vmatprep.mubr.f32.mxu1 %v941_v16  ;;  %v210_v29 = vld [vmem:[#allocation5 + $0x4f8] sm:$0xff]  ;;  %v216_v30 = vld [vmem:[#allocation5 + $0x528] sm:$0xff]  ;;  %v698_v32 = vpack.c.bf16 %v203_v26, %v197_v24  ;;  %v636_v33 = vpack.c.bf16 %v214_v28, %v208_v27  ;;  %v207_v34 = vld [vmem:[#allocation5 + $0x4e0] sm:$0xff] }
  0x4c   :  { %619 = vmatpush1.bf16.msra.mxu0 %v618_v46  ;;  %v213_v35 = vld [vmem:[#allocation5 + $0x510] sm:$0xff]  ;;  %v700_v37 = vpack.c.bf16 %v216_v30, %v210_v29  ;;  %v215_v38 = vld [vmem:[#allocation5 + $0x520] sm:$0xff]  ;;  %v220_v39 = vld [vmem:[#allocation5 + $0x548] sm:$0xff] }
  0x4d   :  { %683 = vmatpush1.bf16.msra.mxu1 %v682_v47  ;;  %621 = vmatprep.subr.bf16.mxu0 %v620_v48  ;;  %v209_v36 = vld [vmem:[#allocation5 + $0x4f0] sm:$0xff]  ;;  %v226_v40 = vld [vmem:[#allocation5 + $0x578] sm:$0xff]  ;;  %v228_v42 = vld [vmem:[#allocation5 + $0x588] sm:$0xff]  ;;  %v638_v43 = vpack.c.bf16 %v213_v35, %v207_v34 }
  0x4e   :  { %685 = vmatprep.subr.bf16.mxu1 %v684_v52  ;;  %v222_v41 = vld [vmem:[#allocation5 + $0x558] sm:$0xff]  ;;  %v702_v44 = vpack.c.bf16 %v215_v38, %v209_v36  ;;  %v640_v45 = vpack.c.bf16 %v226_v40, %v220_v39  ;;  %v219_v46 = vld [vmem:[#allocation5 + $0x540] sm:$0xff]  ;;  %v225_v47 = vld [vmem:[#allocation5 + $0x570] sm:$0xff] }
  0x4f   :  { %v221_v48 = vld [vmem:[#allocation5 + $0x550] sm:$0xff]  ;;  %v704_v49 = vpack.c.bf16 %v228_v42, %v222_v41  ;;  %v227_v50 = vld [vmem:[#allocation5 + $0x580] sm:$0xff]  ;;  %v232_v51 = vld [vmem:[#allocation5 + $0x5a8] sm:$0xff]  ;;  %v642_v55 = vpack.c.bf16 %v225_v47, %v219_v46 }
  0x50   :  { %623 = vmatpush1.bf16.msra.mxu0 %v622_v58  ;;  %v238_v52 = vld [vmem:[#allocation5 + $0x5d8] sm:$0xff]  ;;  %v240_v54 = vld [vmem:[#allocation5 + $0x5e8] sm:$0xff]  ;;  %v706_v56 = vpack.c.bf16 %v227_v50, %v221_v48  ;;  %v231_v58 = vld [vmem:[#allocation5 + $0x5a0] sm:$0xff] }
  0x51   :  { %687 = vmatpush1.bf16.msra.mxu1 %v686_v59  ;;  %625 = vmatprep.subr.bf16.mxu0 %v624_v60  ;;  %v234_v53 = vld [vmem:[#allocation5 + $0x5b8] sm:$0xff]  ;;  %v644_v57 = vpack.c.bf16 %v238_v52, %v232_v51  ;;  %v237_v59 = vld [vmem:[#allocation5 + $0x5d0] sm:$0xff]  ;;  %v239_v62 = vld [vmem:[#allocation5 + $0x5e0] sm:$0xff] }
  0x52   :  { %689 = vmatprep.subr.bf16.mxu1 %v688_v0  ;;  %v233_v60 = vld [vmem:[#allocation5 + $0x5b0] sm:$0xff]  ;;  %v708_v61 = vpack.c.bf16 %v240_v54, %v234_v53  ;;  %v56_v63 = vld [vmem:[#allocation5 + $0x28] sm:$0xff]  ;;  %v62_v0 = vld [vmem:[#allocation5 + $0x58] sm:$0xff]  ;;  %v646_v1 = vpack.c.bf16 %v237_v59, %v231_v58 }
  0x53   :  { %v710_v2 = vpack.c.bf16 %v239_v62, %v233_v60  ;;  %v712_v3 = vpack.c.bf16 %v62_v0, %v56_v63  ;;  %v55_v4 = vld [vmem:[#allocation5 + $0x20] sm:$0xff]  ;;  %v61_v5 = vld [vmem:[#allocation5 + $0x50] sm:$0xff]  ;;  %v74_v7 = vld [vmem:[#allocation5 + $0xb8] sm:$0xff] }
  0x54   :  { %627 = vmatpush1.bf16.msra.mxu0 %v626_v6  ;;  %v68_v6 = vld [vmem:[#allocation5 + $0x88] sm:$0xff]  ;;  %v67_v11 = vld [vmem:[#allocation5 + $0x80] sm:$0xff]  ;;  %v73_v12 = vld [vmem:[#allocation5 + $0xb0] sm:$0xff] }
  0x55   :  { %691 = vmatpush1.bf16.msra.mxu1 %v690_v8  ;;  %629 = vmatprep.subr.bf16.mxu0 %v628_v9  ;;  %v945_v8 = vld [vmem:[#allocation2] sm:$0xff]  ;;  %v714_v9 = vpack.c.bf16 %v61_v5, %v55_v4  ;;  %v716_v10 = vpack.c.bf16 %v74_v7, %v68_v6  ;;  %v86_v14 = vld [vmem:[#allocation5 + $0x118] sm:$0xff]  ;;  %v718_v17 = vpack.c.bf16 %v73_v12, %v67_v11  ;;  %v951_v18 = vld [vmem:[#allocation2 + $0x10] sm:$0xff] }
  0x56   :  { %693 = vmatprep.subr.bf16.mxu1 %v692_v13  ;;  %v80_v13 = vld [vmem:[#allocation5 + $0xe8] sm:$0xff]  ;;  %v948_v15 = vld [vmem:[#allocation2 + $0x18] sm:$0xff]  ;;  %v957_v26 = vld [vmem:[#allocation2 + $0x20] sm:$0xff] }
  0x57   :  { %v92_v22 = vld [vmem:[#allocation5 + $0x148] sm:$0xff]  ;;  %v98_v23 = vld [vmem:[#allocation5 + $0x178] sm:$0xff]  ;;  %v91_v28 = vld [vmem:[#allocation5 + $0x140] sm:$0xff] }
  0x58   :  { %631 = vmatpush1.bf16.msra.mxu0 %v630_v19  ;;  %v720_v19 = vpack.c.bf16 %v86_v14, %v80_v13  ;;  %v48_v24 = vld [vmem:[#allocation2 + $0x28] sm:$0xff]  ;;  %v724_v27 = vpack.c.bf16 %v98_v23, %v92_v22  ;;  %v97_v29 = vld [vmem:[#allocation5 + $0x170] sm:$0xff]  ;;  %v103_v36 = vld [vmem:[#allocation5 + $0x1a0] sm:$0xff] }
  0x59   :  { %695 = vmatpush1.bf16.msra.mxu1 %v694_v20  ;;  %633 = vmatprep.subr.bf16.mxu0 %v632_v21  ;;  %v79_v20 = vld [vmem:[#allocation5 + $0xe0] sm:$0xff]  ;;  %v85_v21 = vld [vmem:[#allocation5 + $0x110] sm:$0xff]  ;;  %v104_v30 = vld [vmem:[#allocation5 + $0x1a8] sm:$0xff] }
  0x5a   :  { %697 = vmatprep.subr.bf16.mxu1 %v696_v25  ;;  %v722_v25 = vpack.c.bf16 %v85_v21, %v79_v20  ;;  %v963_v34 = vld [vmem:[#allocation2 + $0x30] sm:$0xff]  ;;  %v116_v38 = vld [vmem:[#allocation5 + $0x208] sm:$0xff]  ;;  %v122_v39 = vld [vmem:[#allocation5 + $0x238] sm:$0xff] }
  0x5b   :  { %v732_v41 = vpack.c.bf16 %v122_v39, %v116_v38  ;;  %v115_v42 = vld [vmem:[#allocation5 + $0x200] sm:$0xff]  ;;  %v140_v50 = vld [vmem:[#allocation5 + $0x2c8] sm:$0xff]  ;;  %v146_v51 = vld [vmem:[#allocation5 + $0x2f8] sm:$0xff] }
  0x5c   :  { %635 = vmatpush1.bf16.msra.mxu0 %v634_v31  ;;  %v110_v31 = vld [vmem:[#allocation5 + $0x1d8] sm:$0xff]  ;;  %v127_v48 = vld [vmem:[#allocation5 + $0x260] sm:$0xff]  ;;  %v740_v53 = vpack.c.bf16 %v146_v51, %v140_v50  ;;  %v157_v60 = vld [vmem:[#allocation5 + $0x350] sm:$0xff] }
  0x5d   :  { %699 = vmatpush1.bf16.msra.mxu1 %v698_v32  ;;  %637 = vmatprep.subr.bf16.mxu0 %v636_v33  ;;  %v960_v32 = vld [vmem:[#allocation2 + $0x38] sm:$0xff]  ;;  %v726_v33 = vpack.c.bf16 %v97_v29, %v91_v28  ;;  %v728_v35 = vpack.c.bf16 %v110_v31, %v104_v30  ;;  %v139_v54 = vld [vmem:[#allocation5 + $0x2c0] sm:$0xff]  ;;  %v217_v31 = vld [vmem:[#allocation5 + $0x530] sm:$0xff] }
  0x5e   :  { %701 = vmatprep.subr.bf16.mxu1 %v700_v37  ;;  %v109_v37 = vld [vmem:[#allocation5 + $0x1d0] sm:$0xff]  ;;  %v151_v59 = vld [vmem:[#allocation5 + $0x320] sm:$0xff]  ;;  %v170_v62 = vld [vmem:[#allocation5 + $0x3b8] sm:$0xff] }
  0x5f   :  { %v730_v40 = vpack.c.bf16 %v109_v37, %v103_v36  ;;  %v746_v63 = vpack.c.bf16 %v157_v60, %v151_v59  ;;  %v182_v4 = vld [vmem:[#allocation5 + $0x418] sm:$0xff]  ;;  %v175_v7 = vld [vmem:[#allocation5 + $0x3e0] sm:$0xff]  ;;  %v229_v39 = vld [vmem:[#allocation5 + $0x590] sm:$0xff] }
  0x60   :  { %639 = vmatpush1.bf16.msra.mxu0 %v638_v43  ;;  %v121_v43 = vld [vmem:[#allocation5 + $0x230] sm:$0xff]  ;;  %v194_v11 = vld [vmem:[#allocation5 + $0x478] sm:$0xff]  ;;  %v187_v14 = vld [vmem:[#allocation5 + $0x440] sm:$0xff] }
  0x61   :  { %703 = vmatpush1.bf16.msra.mxu1 %v702_v44  ;;  %641 = vmatprep.subr.bf16.mxu0 %v640_v45  ;;  %v128_v44 = vld [vmem:[#allocation5 + $0x268] sm:$0xff]  ;;  %v134_v45 = vld [vmem:[#allocation5 + $0x298] sm:$0xff]  ;;  %v734_v46 = vpack.c.bf16 %v121_v43, %v115_v42  ;;  %v199_v23 = vld [vmem:[#allocation5 + $0x4a0] sm:$0xff] }
  0x62   :  { %705 = vmatprep.subr.bf16.mxu1 %v704_v49  ;;  %v736_v47 = vpack.c.bf16 %v134_v45, %v128_v44  ;;  %v133_v49 = vld [vmem:[#allocation5 + $0x290] sm:$0xff]  ;;  %v206_v20 = vld [vmem:[#allocation5 + $0x4d8] sm:$0xff]  ;;  %v211_v30 = vld [vmem:[#allocation5 + $0x500] sm:$0xff] }
  0x63   :  { %v738_v52 = vpack.c.bf16 %v133_v49, %v127_v48  ;;  %v766_v36 = vpack.c.bf16 %v217_v31, %v211_v30  ;;  %v223_v38 = vld [vmem:[#allocation5 + $0x560] sm:$0xff]  ;;  %v241_v45 = vld [vmem:[#allocation5 + $0x5f0] sm:$0xff] }
  0x64   :  { %643 = vmatpush1.bf16.msra.mxu0 %v642_v55  ;;  %v145_v55 = vld [vmem:[#allocation5 + $0x2f0] sm:$0xff]  ;;  %v770_v42 = vpack.c.bf16 %v229_v39, %v223_v38  ;;  %v235_v44 = vld [vmem:[#allocation5 + $0x5c0] sm:$0xff] }
  0x65   :  { %707 = vmatpush1.bf16.msra.mxu1 %v706_v56  ;;  %645 = vmatprep.subr.bf16.mxu0 %v644_v57  ;;  %v158_v56 = vld [vmem:[#allocation5 + $0x358] sm:$0xff]  ;;  %v742_v57 = vpack.c.bf16 %v145_v55, %v139_v54  ;;  %v243_v50 = vld [vmem:[%s996_s2] sm:$0x3f]  ;;  %s893_s2 = smov [#allocation7]  }
  0x66   :  { %709 = vmatprep.subr.bf16.mxu1 %v708_v61  ;;  %v164_v61 = vld [vmem:[#allocation5 + $0x388] sm:$0xff]  ;;  %s571_s13 = sshll.u32 %s893_s2, 4  ;;  %s572_s13 = int_to_ptr.vmem [resolvable:$true] %s571_s13 }
  0x67   :  { %v748_v0 = vpack.c.bf16 %v170_v62, %v164_v61  ;;  %s859_s14 = scalar_lea.vmem %s572_s13, 3072  ;;  %p864_p3 = scmp.lt.s32.totalorder %s572_s13, %s572_s13 }
  0x68   :  { %647 = vmatpush1.bf16.msra.mxu0 %v646_v1  ;;  %v163_v1 = vld [vmem:[#allocation5 + $0x380] sm:$0xff]  ;;  %p860_p2 = scmp.ne.s32.totalorder %s572_s13, %s859_s14  ;;  %p865_p4 = scmp.lt.s32.totalorder %s859_s14, %s859_s14 }
  0x69   :  { %711 = vmatpush1.bf16.msra.mxu1 %v710_v2  ;;  %713 = vmatprep.subr.bf16.mxu0 %v712_v3  ;;  %v169_v2 = vld [vmem:[#allocation5 + $0x3b0] sm:$0xff] }
  0x6a   :  { %776 = vmatprep.subr.bf16.mxu1 %v712_v3  ;;  %v176_v3 = vld [vmem:[#allocation5 + $0x3e8] sm:$0xff]  ;;  %v750_v5 = vpack.c.bf16 %v169_v2, %v163_v1  ;;  %p866_p5 = por %p865_p4, %p864_p3 }
  0x6b   :  { %340 = vmatmul.mubr.f32.vlgmr.msra.gmra.mrb[0].mxu0 %v945_v8  ;;  %v752_v6 = vpack.c.bf16 %v182_v4, %v176_v3 }
  0x6c   :  { %429 = vmatmul.mubr.f32.vlgmr.msra.gmra.mrb[0].mxu1 %v945_v8  ;;  %715 = vmatpush1.bf16.msra.mxu0 %v714_v9  ;;  %p867_p6 = pnand %p866_p5, %p860_p2 }
  0x6d   :  { %792 = vmatpush1.bf16.msra.mxu1 %v714_v9  ;;  %717 = vmatprep.subr.bf16.mxu0 %v716_v10  ;;  %v181_v9 = vld [vmem:[#allocation5 + $0x410] sm:$0xff] }
  0x6e   :  { %777 = vmatprep.subr.bf16.mxu1 %v716_v10  ;;  %345 = vmatprep.mubr.f32.mxu0 %v948_v15  ;;  %v188_v10 = vld [vmem:[#allocation5 + $0x448] sm:$0xff]  ;;  %v754_v12 = vpack.c.bf16 %v181_v9, %v175_v7 }
  0x6f   :  { %434 = vmatprep.mubr.f32.mxu1 %v948_v15  ;;  %346 = vmatmul.mubr.f32.gmra.mrb[2].mxu0 %v951_v18  ;;  %v756_v13 = vpack.c.bf16 %v194_v11, %v188_v10 }
  0x70   :  { %719 = vmatpush1.bf16.msra.mxu0 %v718_v17  ;;  %435 = vmatmul.mubr.f32.gmra.mrb[2].mxu1 %v951_v18 }
  0x71   :  { %793 = vmatpush1.bf16.msra.mxu1 %v718_v17  ;;  %721 = vmatprep.subr.bf16.mxu0 %v720_v19  ;;  %v193_v17 = vld [vmem:[#allocation5 + $0x470] sm:$0xff] }
  0x72   :  { %778 = vmatprep.subr.bf16.mxu1 %v720_v19  ;;  %351 = vmatprep.mubr.f32.mxu0 %v48_v24  ;;  %v200_v19 = vld [vmem:[#allocation5 + $0x4a8] sm:$0xff]  ;;  %v758_v21 = vpack.c.bf16 %v193_v17, %v187_v14 }
  0x73   :  { %440 = vmatprep.mubr.f32.mxu1 %v48_v24  ;;  %352 = vmatmul.mubr.f32.gmra.mrb[4].mxu0 %v957_v26  ;;  %v760_v22 = vpack.c.bf16 %v206_v20, %v200_v19 }
  0x74   :  { %723 = vmatpush1.bf16.msra.mxu0 %v722_v25  ;;  %441 = vmatmul.mubr.f32.gmra.mrb[4].mxu1 %v957_v26 }
  0x75   :  { %794 = vmatpush1.bf16.msra.mxu1 %v722_v25  ;;  %725 = vmatprep.subr.bf16.mxu0 %v724_v27  ;;  %v212_v25 = vld [vmem:[#allocation5 + $0x508] sm:$0xff] }
  0x76   :  { %779 = vmatprep.subr.bf16.mxu1 %v724_v27  ;;  %357 = vmatprep.mubr.f32.mxu0 %v960_v32  ;;  %v218_v27 = vld [vmem:[#allocation5 + $0x538] sm:$0xff] }
  0x77   :  { %446 = vmatprep.mubr.f32.mxu1 %v960_v32  ;;  %358 = vmatmul.mubr.f32.gmra.mrb[6].mxu0 %v963_v34  ;;  %v764_v29 = vpack.c.bf16 %v218_v27, %v212_v25 }
  0x78   :  { %727 = vmatpush1.bf16.msra.mxu0 %v726_v33  ;;  %447 = vmatmul.mubr.f32.gmra.mrb[6].mxu1 %v963_v34 }
  0x79   :  { %795 = vmatpush1.bf16.msra.mxu1 %v726_v33  ;;  %729 = vmatprep.subr.bf16.mxu0 %v728_v35  ;;  %v224_v33 = vld [vmem:[#allocation5 + $0x568] sm:$0xff] }
  0x7a   :  { %780 = vmatprep.subr.bf16.mxu1 %v728_v35  ;;  %517 = vmatprep.mubr.f32.mxu0 %v941_v16  ;;  %v152_v16 = vld [vmem:[#allocation5 + $0x328] sm:$0xff]  ;;  %v230_v35 = vld [vmem:[#allocation5 + $0x598] sm:$0xff] }
  0x7b   :  { %529 = vmatprep.mubr.f32.mxu1 %v48_v24  ;;  %v744_v58 = vpack.c.bf16 %v158_v56, %v152_v16  ;;  %v205_v24 = vld [vmem:[#allocation5 + $0x4d0] sm:$0xff]  ;;  %v768_v37 = vpack.c.bf16 %v230_v35, %v224_v33 }
  0x7c   :  { %731 = vmatpush1.bf16.msra.mxu0 %v730_v40  ;;  %v762_v28 = vpack.c.bf16 %v205_v24, %v199_v23 }
  0x7d   :  { %796 = vmatpush1.bf16.msra.mxu1 %v730_v40  ;;  %733 = vmatprep.subr.bf16.mxu0 %v732_v41  ;;  %v236_v40 = vld [vmem:[#allocation5 + $0x5c8] sm:$0xff] }
  0x7e   :  { %781 = vmatprep.subr.bf16.mxu1 %v732_v41  ;;  %v242_v41 = vld [vmem:[#allocation5 + $0x5f8] sm:$0xff] }
  0x7f   :  { %v772_v43 = vpack.c.bf16 %v242_v41, %v236_v40 }
  0x80   :  { %735 = vmatpush1.bf16.msra.mxu0 %v734_v46 }
  0x81   :  { %797 = vmatpush1.bf16.msra.mxu1 %v734_v46  ;;  %737 = vmatprep.subr.bf16.mxu0 %v736_v47  ;;  %v774_v46 = vpack.c.bf16 %v241_v45, %v235_v44 }
  0x82   :  { %782 = vmatprep.subr.bf16.mxu1 %v736_v47  ;;  %v245_v47 = vlaneseq }
  0x84   :  { %739 = vmatpush1.bf16.msra.mxu0 %v738_v52  ;;  %v246_v48 = vshrl.u32 %v245_v47, 7 }
  0x85   :  { %798 = vmatpush1.bf16.msra.mxu1 %v738_v52  ;;  %741 = vmatprep.subr.bf16.mxu0 %v740_v53 }
  0x86   :  { %783 = vmatprep.subr.bf16.mxu1 %v740_v53  ;;  %v247_v49 = vsub.s32 0, %v246_v48  ;;  %v255_v51 = vsub.s32 2, %v246_v48  ;;  %v251_v52 = vsub.s32 1, %v246_v48  ;;  %v263_v23 = vsub.s32 4, %v246_v48 }
  0x87   :  { %v267_v24 = vsub.s32 5, %v246_v48 }
  0x88   :  { %743 = vmatpush1.bf16.msra.mxu0 %v742_v57  ;;  %v248_v53 = vrot.slane %v243_v50, %v247_v49  ;;  %v252_v54 = vrot.slane %v243_v50, %v251_v52  ;;  %v264_v25 = vrot.slane %v243_v50, %v263_v23 }
  0x89   :  { %799 = vmatpush1.bf16.msra.mxu1 %v742_v57  ;;  %745 = vmatprep.subr.bf16.mxu0 %v744_v58  ;;  %v268_v27 = vrot.slane %v243_v50, %v267_v24 }
  0x8a   :  { %784 = vmatprep.subr.bf16.mxu1 %v744_v58 }
  0x8c   :  { %747 = vmatpush1.bf16.msra.mxu0 %v746_v63 }
  0x8d   :  { %800 = vmatpush1.bf16.msra.mxu1 %v746_v63  ;;  %749 = vmatprep.subr.bf16.mxu0 %v748_v0 }
  0x8e   :  { %785 = vmatprep.subr.bf16.mxu1 %v748_v0 }
  0x90   :  { %751 = vmatpush1.bf16.msra.mxu0 %v750_v5 }
  0x91   :  { %801 = vmatpush1.bf16.msra.mxu1 %v750_v5  ;;  %753 = vmatprep.subr.bf16.mxu0 %v752_v6 }
  0x92   :  { %786 = vmatprep.subr.bf16.mxu1 %v752_v6 }
  0x94   :  { %755 = vmatpush1.bf16.msra.mxu0 %v754_v12 }
  0x95   :  { %802 = vmatpush1.bf16.msra.mxu1 %v754_v12  ;;  %757 = vmatprep.subr.bf16.mxu0 %v756_v13 }
  0x96   :  { %787 = vmatprep.subr.bf16.mxu1 %v756_v13 }
  0x98   :  { %759 = vmatpush1.bf16.msra.mxu0 %v758_v21 }
  0x99   :  { %803 = vmatpush1.bf16.msra.mxu1 %v758_v21  ;;  %761 = vmatprep.subr.bf16.mxu0 %v760_v22 }
  0x9a   :  { %788 = vmatprep.subr.bf16.mxu1 %v760_v22 }
  0x9c   :  { %763 = vmatpush1.bf16.msra.mxu0 %v762_v28 }
  0x9d   :  { %804 = vmatpush1.bf16.msra.mxu1 %v762_v28  ;;  %765 = vmatprep.subr.bf16.mxu0 %v764_v29 }
  0x9e   :  { %789 = vmatprep.subr.bf16.mxu1 %v764_v29 }
  0xa0   :  { %767 = vmatpush1.bf16.msra.mxu0 %v766_v36 }
  0xa1   :  { %805 = vmatpush1.bf16.msra.mxu1 %v766_v36  ;;  %769 = vmatprep.subr.bf16.mxu0 %v768_v37 }
  0xa2   :  { %790 = vmatprep.subr.bf16.mxu1 %v768_v37 }
  0xa4   :  { %771 = vmatpush1.bf16.msra.mxu0 %v770_v42 }
  0xa5   :  { %806 = vmatpush1.bf16.msra.mxu1 %v770_v42  ;;  %773 = vmatprep.subr.bf16.mxu0 %v772_v43 }
  0xa6   :  { %791 = vmatprep.subr.bf16.mxu1 %v772_v43 }
  0xa8   :  { %775 = vmatpush1.bf16.msra.mxu0 %v774_v46 }
  0xa9   :  { %807 = vmatpush1.bf16.msra.mxu1 %v774_v46 }
  0xab   :  { %518 = vmatmul.mubr.f32.vlgmr.msra.gmra.mrb[8].mxu0 %v945_v8  ;;  %v259_v8 = vsub.s32 3, %v246_v48 }
  0xac   :  { %530 = vmatmul.mubr.f32.vlgmr.msra.gmra.mrb[8].mxu1 %v957_v26  ;;  %523 = vmatprep.mubr.f32.mxu0 %v948_v15  ;;  %v256_v26 = vrot.slane %v243_v50, %v255_v51 }
  0xad   :  { %535 = vmatprep.mubr.f32.mxu1 %v960_v32  ;;  %v260_v15 = vrot.slane %v243_v50, %v259_v8 }
  0xaf   :  { %524 = vmatmul.mubr.f32.gmra.mrb[10].mxu0 %v951_v18 }
  0xb0   :  { %536 = vmatmul.mubr.f32.gmra.mrb[10].mxu1 %v963_v34 }
 0x13e   :  { %v341_v55 = vpop.f32.mrb[0].mxu0 }
 0x13f   :  { %v342_v32 = vadd.f32 %v341_v55, %v248_v53  ;;  %v430_v16 = vpop.f32.mrb[0].mxu1  ;;  %v343_v18 = vpop.f32.mrb[1].mxu0 }
 0x140   :  { %v431_v56 = vadd.f32 %v430_v16, %v256_v26  ;;  %v344_v34 = vadd.f32 %v343_v18, %v252_v54  ;;  %v432_v57 = vpop.f32.mrb[1].mxu1 }
 0x141   :  { %542 = vst [vmem:[#allocation7] sm:$0xff] %v342_v32  ;;  %v433_v58 = vadd.f32 %v432_v57, %v260_v15 }
 0x142   :  { %544 = vst [vmem:[#allocation7 + $0x10] sm:$0xff] %v431_v56  ;;  %543 = vst [vmem:[#allocation7 + $0x8] sm:$0xff] %v344_v34  ;;  %v347_v59 = vpop.f32.mrb[2].mxu0 }
 0x143   :  { %545 = vst [vmem:[#allocation7 + $0x18] sm:$0xff] %v433_v58  ;;  %v348_v60 = vadd.f32 %v347_v59, %v248_v53  ;;  %v436_v61 = vpop.f32.mrb[2].mxu1  ;;  %v349_v62 = vpop.f32.mrb[3].mxu0 }
 0x144   :  { %v437_v63 = vadd.f32 %v436_v61, %v256_v26  ;;  %v350_v0 = vadd.f32 %v349_v62, %v252_v54  ;;  %v438_v1 = vpop.f32.mrb[3].mxu1 }
 0x145   :  { %548 = vst [vmem:[#allocation7 + $0x30] sm:$0xff] %v348_v60  ;;  %v439_v2 = vadd.f32 %v438_v1, %v260_v15 }
 0x146   :  { %550 = vst [vmem:[#allocation7 + $0x40] sm:$0xff] %v437_v63  ;;  %549 = vst [vmem:[#allocation7 + $0x38] sm:$0xff] %v350_v0  ;;  %v353_v3 = vpop.f32.mrb[4].mxu0 }
 0x147   :  { %551 = vst [vmem:[#allocation7 + $0x48] sm:$0xff] %v439_v2  ;;  %v354_v4 = vadd.f32 %v353_v3, %v248_v53  ;;  %v442_v5 = vpop.f32.mrb[4].mxu1  ;;  %v355_v6 = vpop.f32.mrb[5].mxu0 }
 0x148   :  { %v443_v7 = vadd.f32 %v442_v5, %v256_v26  ;;  %v356_v9 = vadd.f32 %v355_v6, %v252_v54  ;;  %v444_v10 = vpop.f32.mrb[5].mxu1 }
 0x149   :  { %554 = vst [vmem:[#allocation7 + $0x60] sm:$0xff] %v354_v4  ;;  %v445_v11 = vadd.f32 %v444_v10, %v260_v15 }
 0x14a   :  { %556 = vst [vmem:[#allocation7 + $0x70] sm:$0xff] %v443_v7  ;;  %555 = vst [vmem:[#allocation7 + $0x68] sm:$0xff] %v356_v9  ;;  %v359_v12 = vpop.f32.mrb[6].mxu0 }
 0x14b   :  { %557 = vst [vmem:[#allocation7 + $0x78] sm:$0xff] %v445_v11  ;;  %v360_v13 = vadd.f32 %v359_v12, %v248_v53  ;;  %v448_v14 = vpop.f32.mrb[6].mxu1  ;;  %v361_v17 = vpop.f32.mrb[7].mxu0 }
 0x14c   :  { %v449_v19 = vadd.f32 %v448_v14, %v256_v26  ;;  %v362_v20 = vadd.f32 %v361_v17, %v252_v54  ;;  %v450_v21 = vpop.f32.mrb[7].mxu1 }
 0x14d   :  { %560 = vst [vmem:[#allocation7 + $0x90] sm:$0xff] %v360_v13  ;;  %v451_v22 = vadd.f32 %v450_v21, %v260_v15 }
 0x14e   :  { %562 = vst [vmem:[#allocation7 + $0xa0] sm:$0xff] %v449_v19  ;;  %561 = vst [vmem:[#allocation7 + $0x98] sm:$0xff] %v362_v20 }
 0x14f   :  { %563 = vst [vmem:[#allocation7 + $0xa8] sm:$0xff] %v451_v22 }
 0x17e   :  { %v519_v28 = vpop.f32.mrb[8].mxu0 }
 0x17f   :  { %v520_v29 = vadd.f32 %v519_v28, %v264_v25  ;;  %v531_v30 = vpop.f32.mrb[8].mxu1  ;;  %v521_v31 = vpop.f32.mrb[9].mxu0 }
 0x180   :  { %v532_v33 = vadd.f32 %v531_v30, %v264_v25  ;;  %v522_v35 = vadd.f32 %v521_v31, %v268_v27  ;;  %v533_v36 = vpop.f32.mrb[9].mxu1 }
 0x181   :  { %546 = vst [vmem:[#allocation7 + $0x20] sm:$0xff] %v520_v29  ;;  %v534_v37 = vadd.f32 %v533_v36, %v268_v27 }
 0x182   :  { %558 = vst [vmem:[#allocation7 + $0x80] sm:$0xff] %v532_v33  ;;  %547 = vst [vmem:[#allocation7 + $0x28] sm:$0xff] %v522_v35  ;;  %v525_v38 = vpop.f32.mrb[10].mxu0 }
 0x183   :  { %559 = vst [vmem:[#allocation7 + $0x88] sm:$0xff] %v534_v37  ;;  %v526_v39 = vadd.f32 %v525_v38, %v264_v25  ;;  %v537_v40 = vpop.f32.mrb[10].mxu1  ;;  %v527_v41 = vpop.f32.mrb[11].mxu0 }
 0x184   :  { %v538_v42 = vadd.f32 %v537_v40, %v264_v25  ;;  %v528_v43 = vadd.f32 %v527_v41, %v268_v27  ;;  %v539_v44 = vpop.f32.mrb[11].mxu1 }
 0x185   :  { %552 = vst [vmem:[#allocation7 + $0x50] sm:$0xff] %v526_v39  ;;  %v540_v45 = vadd.f32 %v539_v44, %v268_v27 }
 0x186   :  { %564 = vst [vmem:[#allocation7 + $0xb0] sm:$0xff] %v538_v42  ;;  %553 = vst [vmem:[#allocation7 + $0x58] sm:$0xff] %v528_v43 }
 0x187   :  { %565 = vst [vmem:[#allocation7 + $0xb8] sm:$0xff] %v540_v45 }
 0x188   :  { %870 = shalt.err (!%p867_p6)
}
 0x189   :  { %s871_s17 = scalar_lea.hbm %s997_s3, 3072 }
 0x18a   :  { %p872_p7 = scmp.ne.s32.totalorder %s997_s3, %s871_s17  ;;  %p875_p8 = scmp.lt.u32.totalorder %s871_s17, %s997_s3 }
 0x18c   :  { %p877_p9 = pnand %p875_p8, %p872_p7 }
 0x18e   :  { %880 = shalt.err (!%p877_p9)
}
 0x18f   :  { %577 = dma.vmem_to_hbm [thread:$0]  %s572_s13, 3072, %s997_s3, [#allocation4], %s891_s0, %s891_s0, %s892_s9  }
 0x190   :  { %885 = dma.done.wait [#allocation4], 3072  }
 0x191   :  { %886 = vsyncadd [#allocation4], 4294964224 }
 0x192   :  { %581 = vsyncpa [#allocation3], 1 }
 0x193   :  { %582 = vsyncpa [#allocation6], 1 }
 0x194   :  { %583 = vsyncpa [#allocation4], 1 }

</bundles_post_ra>
